<compile_context>
chip_gen: v5e
topology: v5e:2x2
jax: 0.10.0
libtpu: 0.0.40
codegen_flags: <defaults>
</compile_context>

<pallas_src>
import functools

import jax
import jax.numpy as jnp
from jax import lax
from jax.experimental import pallas as pl
from jax.experimental.pallas import tpu as pltpu

_LANE = 128          # vreg lane width: batch tiles must be multiples of this
_DEF_TILE = 8192     # target columns per grid step (amortises ~0.35us step cost)
_MAX_TILE = 32768    # hard cap so tiles always fit default scoped VMEM (v5e: 16 MiB)
_MIN_STEPS = 4       # >= 2 pipelined steps per TensorCore on v7x's 2-core chip


def _round_up(n, m):
    return ((n + m - 1) // m) * m


def _choose_grid(batch, tb_target):
    """Pick (tile_cols, padded_cols).

    Tiles are lane multiples <= the cap; there are >= _MIN_STEPS (preferably
    even) grid steps whenever the batch allows it so both v7x TensorCores get
    pipelined work; total padding stays below one tile."""
    tb_target = max(_LANE, min(int(tb_target), _MAX_TILE))
    bp = _round_up(max(batch, 1), _LANE)
    n_lanes = bp // _LANE
    n_steps = min(max(_MIN_STEPS, pl.cdiv(bp, tb_target)), n_lanes)
    if n_steps > 1 and n_steps % 2:
        n_steps = min(n_steps + 1, n_lanes)        # even split across 2 cores
    lanes_per_tile = pl.cdiv(n_lanes, n_steps)
    tb = lanes_per_tile * _LANE
    n_steps = pl.cdiv(bp, tb)
    return tb, n_steps * tb


def mynet_kernel(x_ref, w1_ref, b1_ref, w2_ref, b2_ref, out_ref):
    """One batch tile: y = W2 @ relu(W1 @ X + b1) + b2, fully fused in VMEM.

    x arrives in its HBM dtype and is cast to the weights' compute dtype here
    (saves a separate XLA cast pass over the input); accumulation, bias adds
    and ReLU stay in f32; the final store casts to out_ref.dtype (f32 / bf16)."""
    w1 = w1_ref[...]                               # (H, 4)   compute dtype
    w2 = w2_ref[...]                               # (3, H)   compute dtype
    x = x_ref[...].astype(w1.dtype)                # (4, TB)  in-kernel cast

    # Default-precision f32 dots lower to bf16 multi-pass on the MXU; request
    # the exact thing when the caller asked for the f32 "exact" fallback.
    prec = lax.Precision.HIGHEST if w1.dtype == jnp.float32 else None

    h = jnp.dot(w1, x, preferred_element_type=jnp.float32,
                precision=prec) + b1_ref[...]      # (H, TB) f32
    h = jnp.maximum(h, 0.0)                        # ReLU in f32
    y = jnp.dot(w2, h.astype(w2.dtype), preferred_element_type=jnp.float32,
                precision=prec) + b2_ref[...]      # (3, TB) f32
    out_ref[...] = y.astype(out_ref.dtype)


def _mynet_pallas(x_fm, w1, b1, w2, b2, tb, out_dtype):
    """x_fm: (4, Bp) feature-major with Bp % tb == 0 and tb % 128 == 0."""
    f_in, bp = x_fm.shape
    hidden, out_dim = w1.shape[0], w2.shape[0]
    assert tb % _LANE == 0 and bp % tb == 0

    return pl.pallas_call(
        mynet_kernel,
        out_shape=jax.ShapeDtypeStruct((out_dim, bp), out_dtype),
        grid=(bp // tb,),
        in_specs=[
            pl.BlockSpec((f_in, tb), lambda i: (0, i)),         # streamed/pipelined
            pl.BlockSpec((hidden, f_in), lambda i: (0, 0)),     # VMEM-resident
            pl.BlockSpec((hidden, 1), lambda i: (0, 0)),        # VMEM-resident
            pl.BlockSpec((out_dim, hidden), lambda i: (0, 0)),  # VMEM-resident
            pl.BlockSpec((out_dim, 1), lambda i: (0, 0)),       # VMEM-resident
        ],
        out_specs=pl.BlockSpec((out_dim, tb), lambda i: (0, i)),
        compiler_params=pltpu.CompilerParams(
            dimension_semantics=("parallel",),   # megacore-shard batch on v7x
        ),
    )(x_fm, w1, b1, w2, b2)


def prepare_params(w1, b1, w2, b2, compute_dtype=jnp.bfloat16):
    """One-time parameter prep (outside the hot path).

    PyTorch (out, in) weights are used as-is by the feature-major kernel (no
    transposes); biases become f32 column vectors that broadcast over the lane
    (batch) axis inside the kernel."""
    return (
        w1.astype(compute_dtype),                # (H, 4)
        b1.astype(jnp.float32).reshape(-1, 1),   # (H, 1)
        w2.astype(compute_dtype),                # (3, H)
        b2.astype(jnp.float32).reshape(-1, 1),   # (3, 1)
    )


@functools.partial(jax.jit, static_argnames=("tb", "out_dtype"))
def mynet_forward_fm(x_fm, params, tb=_DEF_TILE, out_dtype=jnp.float32):
    """Fast path: x_fm is feature-major (4, B); returns feature-major (3, B).

    No transposes, no wrapper-side cast (the kernel casts x itself); only a
    < one-tile zero-pad when B is not a multiple of the chosen tile."""
    w1c, b1c, w2c, b2c = params
    b = x_fm.shape[1]
    tile, bp = _choose_grid(b, tb)
    if bp != b:
        x_fm = jnp.pad(x_fm, ((0, 0), (0, bp - b)))
    y_fm = _mynet_pallas(x_fm, w1c, b1c, w2c, b2c, tile, out_dtype)
    return y_fm if bp == b else y_fm[:, :b]


@functools.partial(jax.jit, static_argnames=("tb", "out_dtype"))
def mynet_forward(x, params, tb=_DEF_TILE, out_dtype=jnp.float32):
    """PyTorch-layout drop-in: x (B, 4) -> (B, 3).

    The two transposes are the only layout glue left; callers that already
    hold feature-major activations should use mynet_forward_fm instead."""
    return mynet_forward_fm(x.T, params, tb=tb, out_dtype=out_dtype).T


def init_params(key, hidden=12):
    """Deterministic PyTorch-style (Kaiming-uniform-ish) init for fc1/fc2."""
    k1, k2, k3, k4 = jax.random.split(key, 4)
    in1, in2 = 4, hidden
    bound1 = 1.0 / jnp.sqrt(in1)
    bound2 = 1.0 / jnp.sqrt(in2)
    w1 = jax.random.uniform(k1, (hidden, in1), jnp.float32, -bound1, bound1)
    b1 = jax.random.uniform(k2, (hidden,), jnp.float32, -bound1, bound1)
    w2 = jax.random.uniform(k3, (3, in2), jnp.float32, -bound2, bound2)
    b2 = jax.random.uniform(k4, (3,), jnp.float32, -bound2, bound2)
    return w1, b1, w2, b2


def ref_forward_f32(x, w1, b1, w2, b2):
    """Exact f32 reference (explicit HIGHEST precision so XLA doesn't bf16 it)."""
    h = jnp.maximum(jnp.dot(x, w1.T, precision=lax.Precision.HIGHEST) + b1, 0.0)
    return jnp.dot(h, w2.T, precision=lax.Precision.HIGHEST) + b2


def ref_forward_matched(x, w1, b1, w2, b2, compute_dtype):
    """Same math as the kernel (compute-dtype matmuls, f32 accumulation)."""
    xc = x.T.astype(compute_dtype)
    h = jnp.dot(w1.astype(compute_dtype), xc,
                preferred_element_type=jnp.float32) + b1[:, None]
    h = jnp.maximum(h, 0.0).astype(compute_dtype)
    y = jnp.dot(w2.astype(compute_dtype), h,
                preferred_element_type=jnp.float32) + b2[:, None]
    return y.T


if __name__ == "__main__":
    key = jax.random.PRNGKey(0)
    kx, kp, kx2 = jax.random.split(key, 3)

    HIDDEN = 12          # super_para[0] == 12  (self.fn = [4, 12, 3])
    B = 512              # small harness shape -> grid=(4,) of 128-col tiles

    x = jax.random.normal(kx, (B, 4), jnp.float32)
    w1, b1, w2, b2 = init_params(kp, hidden=HIDDEN)
    ref32 = ref_forward_f32(x, w1, b1, w2, b2)

    # --- default path: bf16 compute (MXU-native on every generation), f32 out
    params_bf16 = prepare_params(w1, b1, w2, b2, compute_dtype=jnp.bfloat16)
    out_bf16 = jax.block_until_ready(mynet_forward(x, params_bf16))
    assert out_bf16.shape == (B, 3)
    ref_match = ref_forward_matched(x, w1, b1, w2, b2, jnp.bfloat16)
    assert jnp.allclose(out_bf16, ref_match, atol=1e-2, rtol=1e-2)
    assert jnp.allclose(out_bf16, ref32, atol=1.5e-1, rtol=5e-2)

    # --- feature-major fast path + bf16 output (halved writeback traffic)
    out_fm = jax.block_until_ready(
        mynet_forward_fm(x.T, params_bf16, out_dtype=jnp.bfloat16))
    assert out_fm.shape == (3, B) and out_fm.dtype == jnp.bfloat16
    assert jnp.allclose(out_fm.astype(jnp.float32).T, ref_match,
                        atol=5e-2, rtol=5e-2)

    # --- exact-semantics fallback: f32 streaming + HIGHEST-precision dots
    params_f32 = prepare_params(w1, b1, w2, b2, compute_dtype=jnp.float32)
    out_f32 = jax.block_until_ready(mynet_forward(x, params_f32))
    assert out_f32.shape == (B, 3)
    assert jnp.allclose(out_f32, ref32, atol=1e-3, rtol=1e-3)

    # --- ragged batch (exercises the < one-tile pad + slice path)
    x2 = jax.random.normal(kx2, (200, 4), jnp.float32)
    out2 = jax.block_until_ready(mynet_forward(x2, params_f32))
    assert out2.shape == (200, 3)
    ref2 = ref_forward_f32(x2, w1, b1, w2, b2)
    assert jnp.allclose(out2, ref2, atol=1e-3, rtol=1e-3)

    # TODO(synk): CrossEntropyLoss / SGD / set_paras-vec2para GA plumbing are
    # training/host utilities, not part of the forward pass, so not kernelized.
    print("KERNEL_OK")
</pallas_src>

<mosaic_0001>
module attributes {stable_mosaic.version = 11 : i64} {
  func.func @mynet_kernel(%arg0: i32, %arg1: memref<4x128xf32, #tpu.memory_space<vmem>>, %arg2: memref<12x4xbf16, #tpu.memory_space<vmem>>, %arg3: memref<12x1xf32, #tpu.memory_space<vmem>>, %arg4: memref<3x12xbf16, #tpu.memory_space<vmem>>, %arg5: memref<3x1xf32, #tpu.memory_space<vmem>>, %arg6: memref<3x128xf32, #tpu.memory_space<vmem>>) attributes {dimension_semantics = [#tpu.dimension_semantics<parallel>], iteration_bounds = array<i64: 4>, scalar_prefetch = 0 : i64, scratch_operands = 0 : i64, tpu.core_type = #tpu.core_type<tc>, window_params = [{transform_indices = @transform_0, window_bounds = array<i64: 4, 128>}, {pipeline_mode = #tpu.pipeline_mode<synchronous>, transform_indices = @transform_1, window_bounds = array<i64: 12, 4>}, {pipeline_mode = #tpu.pipeline_mode<synchronous>, transform_indices = @transform_2, window_bounds = array<i64: 12, 1>}, {pipeline_mode = #tpu.pipeline_mode<synchronous>, transform_indices = @transform_3, window_bounds = array<i64: 3, 12>}, {pipeline_mode = #tpu.pipeline_mode<synchronous>, transform_indices = @transform_4, window_bounds = array<i64: 3, 1>}, {transform_indices = @transform_5, window_bounds = array<i64: 3, 128>}]} {
    %c0 = arith.constant 0 : index
    %c0_0 = arith.constant 0 : index
    %0 = vector.load %arg2[%c0, %c0_0] : memref<12x4xbf16, #tpu.memory_space<vmem>>, vector<12x4xbf16>
    %c0_1 = arith.constant 0 : index
    %c0_2 = arith.constant 0 : index
    %1 = vector.load %arg4[%c0_1, %c0_2] : memref<3x12xbf16, #tpu.memory_space<vmem>>, vector<3x12xbf16>
    %c0_3 = arith.constant 0 : index
    %c0_4 = arith.constant 0 : index
    %2 = vector.load %arg1[%c0_3, %c0_4] : memref<4x128xf32, #tpu.memory_space<vmem>>, vector<4x128xf32>
    %3 = arith.truncf %2 : vector<4x128xf32> to vector<4x128xbf16>
    %cst = arith.constant dense<0.000000e+00> : vector<12x128xf32>
    %4 = tpu.matmul %0, %3, %cst {dimension_numbers = #tpu.dot_dimension_numbers<[1], [0], [0], [1], [0, 0, 1, 1], [], []>} : vector<12x4xbf16>, vector<4x128xbf16>, vector<12x128xf32> -> vector<12x128xf32>
    %c0_5 = arith.constant 0 : index
    %c0_6 = arith.constant 0 : index
    %5 = vector.load %arg3[%c0_5, %c0_6] : memref<12x1xf32, #tpu.memory_space<vmem>>, vector<12x1xf32>
    %6 = vector.broadcast %5 : vector<12x1xf32> to vector<12x128xf32>
    %7 = arith.addf %4, %6 : vector<12x128xf32>
    %cst_7 = arith.constant 0.000000e+00 : f32
    %8 = vector.broadcast %cst_7 : f32 to vector<12x128xf32>
    %9 = arith.maximumf %7, %8 : vector<12x128xf32>
    %10 = arith.truncf %9 : vector<12x128xf32> to vector<12x128xbf16>
    %cst_8 = arith.constant dense<0.000000e+00> : vector<3x128xf32>
    %11 = tpu.matmul %1, %10, %cst_8 {dimension_numbers = #tpu.dot_dimension_numbers<[1], [0], [0], [1], [0, 0, 1, 1], [], []>} : vector<3x12xbf16>, vector<12x128xbf16>, vector<3x128xf32> -> vector<3x128xf32>
    %c0_9 = arith.constant 0 : index
    %c0_10 = arith.constant 0 : index
    %12 = vector.load %arg5[%c0_9, %c0_10] : memref<3x1xf32, #tpu.memory_space<vmem>>, vector<3x1xf32>
    %13 = vector.broadcast %12 : vector<3x1xf32> to vector<3x128xf32>
    %14 = arith.addf %11, %13 : vector<3x128xf32>
    %c0_11 = arith.constant 0 : index
    %c0_12 = arith.constant 0 : index
    %15 = vector.load %arg6[%c0_11, %c0_12] : memref<3x128xf32, #tpu.memory_space<vmem>>, vector<3x128xf32>
    tpu.vector_store %arg6[%c0_11, %c0_12], %14 {strides = array<i32>} : memref<3x128xf32, #tpu.memory_space<vmem>>, vector<3x128xf32>,
    return
  }
  func.func @transform_0(%arg0: i32) -> (i32, i32) {
    %c0_i32 = arith.constant 0 : i32
    %c0_i32_0 = arith.constant 0 : i32
    return %c0_i32, %arg0 : i32, i32
  }
  func.func @transform_1(%arg0: i32) -> (i32, i32) {
    %c0_i32 = arith.constant 0 : i32
    %c0_i32_0 = arith.constant 0 : i32
    %c0_i32_1 = arith.constant 0 : i32
    return %c0_i32, %c0_i32_0 : i32, i32
  }
  func.func @transform_2(%arg0: i32) -> (i32, i32) {
    %c0_i32 = arith.constant 0 : i32
    %c0_i32_0 = arith.constant 0 : i32
    %c0_i32_1 = arith.constant 0 : i32
    return %c0_i32, %c0_i32_0 : i32, i32
  }
  func.func @transform_3(%arg0: i32) -> (i32, i32) {
    %c0_i32 = arith.constant 0 : i32
    %c0_i32_0 = arith.constant 0 : i32
    %c0_i32_1 = arith.constant 0 : i32
    return %c0_i32, %c0_i32_0 : i32, i32
  }
  func.func @transform_4(%arg0: i32) -> (i32, i32) {
    %c0_i32 = arith.constant 0 : i32
    %c0_i32_0 = arith.constant 0 : i32
    %c0_i32_1 = arith.constant 0 : i32
    return %c0_i32, %c0_i32_0 : i32, i32
  }
  func.func @transform_5(%arg0: i32) -> (i32, i32) {
    %c0_i32 = arith.constant 0 : i32
    %c0_i32_0 = arith.constant 0 : i32
    return %c0_i32, %arg0 : i32, i32
  }
}

</mosaic_0001>

<bundles_post_ra>
// kernel: mynet_forward_fm.1
= control target key start
LH: loop header
LB: loop body
LE: loop exit
PB: predicated region body
PF: predicated region fallthrough
CT: control target
= control target key end

     0   :  { %10 = vsyncpa [#allocation3], 0  ;;  %s628_s0 = inlined_call_operand.vmem [shape: f32[4,512], index: 0, kind: input, shape index: {}]   ;;  %s629_s1 = inlined_call_operand.vmem [shape: bf16[12,4], index: 1, kind: input, shape index: {}]   ;;  %s630_s2 = inlined_call_operand.vmem [shape: f32[12,1], index: 2, kind: input, shape index: {}]   ;;  %s631_s3 = inlined_call_operand.vmem [shape: bf16[3,12], index: 3, kind: input, shape index: {}]   ;;  %s632_s4 = inlined_call_operand.vmem [shape: f32[3,1], index: 4, kind: input, shape index: {}]   ;;  %s633_s5 = inlined_call_operand.hbm [shape: f32[3,512], index: 5, kind: output, shape index: {}]  }
   0x1   :  { %12 = vsyncpa [#allocation3 + $0x1], 0  ;;  %s525_s18 = smov 0   ;;  %s527_s19 = smov 0  }
   0x2   :  { %s529_s20 = smov 0   ;;  %s531_s21 = smov 0  }
   0x3 LB: > { %s546_s22 = sadd.s32 4294967295, %s492_s21   ;;  %s371_s23 = sadd.s32 4294967294, %s492_s21   ;;  %s492_s21 = sphi %s531_s21, %s639_s21   ;;  %s488_s20 = sphi %s529_s20, %s638_s20   ;;  %s484_s19 = sphi %s527_s19, %s637_s19   ;;  %s480_s18 = sphi %s525_s18, %s636_s18  }
   0x4   : > { %s550_s24 = sadd.s32 1, %s492_s21   ;;  %s135_s25 = sadd.s32 1, %s488_s20 }
   0x5   : > { %s132_s26 = ssub.s32 %s492_s21, %s550_s24  ;;  %p145_p0 = scmp.ne.s32.totalorder %s488_s20, %s484_s19 }
   0x6   : > { %p133_p1 = scmp.eq.s32.totalorder %s132_s26, 0  ;;  %p146_p2 = scmp.eq.s32.totalorder %s546_s22, 3 }
   0x7   : > { %p151_p3 = scmp.ne.s32.totalorder %s484_s19, %s480_s18  ;;  %p152_p4 = scmp.eq.s32.totalorder %s371_s23, 3 }
   0x8   : > { %s561_s27 = scalar_select %p133_p1, %s488_s20, %s135_s25  }
   0x9   : > { %p563_p5 = por %p146_p2, %p145_p0  ;;  %p567_p6 = por %p152_p4, %p151_p3 }
   0xa   : > { %p374_p7 = scmp.ge.s32.totalorder %s492_s21, 1  ;;  %p189_p8 = scmp.lt.s32.totalorder %s492_s21, 5 }
   0xc   : > { %p190_p9 = pnand %p374_p7, %p189_p8 }
   0xd   : > { %p216_p10 = scmp.lt.s32.totalorder (!%p190_p9), %s546_s22, 3  ;;  %s213_s6 = sand.u32 (!%p190_p9), 1, %s484_s19  }
   0xe   : > { %193 = sbr.rel (%p190_p9) target bundleno = 308 (0x134), region = 40  ;;  %s297_s15 = scalar_lea.sflag (!%p190_p9), [#allocation3], %s213_s6 }
   0xf   : > { %s450_s25 = scalar_lea.hbm (!%p190_p9), %s633_s5, 16 }
  0x13   : > { %v226_v0 = vld [vmem:[%s630_s2] sm:$0xff]  ;;  %s217_s7 = scalar_select %p216_p10, %s546_s22, 3  ;;  %v494_v1 = vmov 0   ;;  %vm247_vm0 = vcmask 1041408   ;;  %v227_v6 = vld [vmem:[%s630_s2 + $0x8] sm:$0xf] }
  0x14   : > { %428 = vset.pattern.permute.xlu0 %v494_v1  ;;  %429 = vset.pattern.permute.xlu1 %v494_v1  ;;  %v379_v3 = vld [vmem:[%s629_s1] sm:$0xf]  ;;  %v387_v4 = vld [vmem:[%s629_s1] sm:$0x30]  ;;  %vm243_vm1 = vcmask 31744   ;;  %vm278_vm2 = vcmask 1045504  }
  0x15   : > { %230 = vperm.xlu0 %428, %v226_v0   ;;  %s376_s8 = sshll.u32 %s217_s7, 2  ;;  %v380_v8 = vor.u32 %v387_v4, %v379_v3  ;;  %v268_v9 = vld [vmem:[%s632_s4] sm:$0x7]  ;;  %vm274_vm3 = vcmask 97280   ;;  %s384_s7 = sshll.u32 %s546_s22, 2 }
  0x16   : > { %s219_s11 = scalar_lea.vmem %s628_s0, %s376_s8  ;;  %271 = vperm.xlu1 %429, %v268_v9   ;;  %v223_v20 = vld [vmem:[%s631_s3] sm:$0x3]  ;;  %s375_s8 = sshll.u32 %s213_s6, 2 }
  0x17   : > { %v224_v2 = vld [vmem:[%s219_s11] sm:$0xf]  ;;  %s307_s11 = scalar_lea.hbm %s633_s5, %s384_s7  ;;  %s215_s12 = scalar_lea.vmem [#allocation2], %s375_s8 }
  0x18   : > { %v225_v5 = vpack.c.bf16 %v224_v2, %v224_v2  ;;  %s309_s13 = sshll.u32 %s215_s12, 4  ;;  %s311_s14 = sshll.u32 %s307_s11, 4  ;;  %s310_s13 = int_to_ptr.vmem [resolvable:$true] %s309_s13  ;;  %s312_s14 = int_to_ptr.hbm [resolvable:$true] %s311_s14 }
  0x19   : > { %s444_s16 = sshra.s32 %s312_s14, 4  ;;  %s445_s16 = int_to_ptr.hbm [resolvable:$true] %s444_s16 }
  0x1a   : > { %v249_v7 = vsel %vm247_vm0, %v225_v5, 0  ;;  %s446_s17 = scalar_lea.hbm %s445_s16, 4  ;;  %p451_p0 = scmp.lt.s32.totalorder %s445_s16, %s633_s5 }
  0x1b   : > { %258 = vmatpush.bf16.msra.mxu0 %v249_v7  ;;  %p447_p11 = scmp.ne.s32.totalorder %s445_s16, %s446_s17  ;;  %p452_p1 = scmp.lt.s32.totalorder %s450_s25, %s446_s17 }
  0x1d   : > { %235 = vperm.xlu0 %428, %v227_v6   ;;  %p448_p12 = pnand %p447_p11, %p563_p5  ;;  %p453_p2 = por %p452_p1, %p451_p0 }
  0x1e   : > { %381 = vmatmul.msk.bf16.vlgmr.msra.gmra.mxu0 %vm243_vm1, %v380_v8 }
  0x1f   : > { %p449_p13 = pneg %p448_p12 }
  0x21   : > { %p454_p3 = pnand %p453_p2, %p449_p13 }
  0x87   : > { %v231_v10 = vpop.permute.xlu0 %230 }
  0x88   : > { %v272_v21 = vpop.permute.xlu1 %271 }
  0x8f   : > { %v236_v13 = vpop.permute.xlu0 %235 }
  0x9b   : > { %v260_v11 = vpop.f32.mrf.mxu0 }
  0x9c   : > { %v261_v12 = vadd.f32 %v260_v11, %v231_v10 }
  0x9e   : > { %v265_v16 = vmax.f32 %v261_v12, 0.0 }
  0xa3   : > { %v262_v14 = vpop.f32.mrf.mxu0 }
  0xa4   : > { %v263_v15 = vadd.f32 %v262_v14, %v236_v13 }
  0xa6   : > { %v266_v17 = vmax.f32 %v263_v15, 0.0 }
  0xa8   : > { %v267_v18 = vpack.c.bf16 %v266_v17, %v265_v16 }
  0xaa   : > { %v280_v19 = vsel %vm278_vm2, %v267_v18, 0 }
  0xab   : > { %289 = vmatpush.bf16.msra.mxu1 %v280_v19 }
  0xae   : > { %382 = vmatmul.msk.bf16.vlgmr.msra.gmra.mxu1 %vm274_vm3, %v223_v20 }
 0x12b   : > { %v291_v22 = vpop.f32.mrf.mxu1 }
 0x12c   : > { %v292_v23 = vadd.f32 %v291_v22, %v272_v21 }
 0x12e   : > { %295 = vst [vmem:[%s215_s12] sm:$0x7] %v292_v23 }
 0x12f   : > { %457 = shalt.err (!%p454_p3)
}
 0x130   : > { %388 = dma.vmem_to_hbm [thread:$0]  (%p563_p5), %s310_s13, 64, %s312_s14, %s297_s15  }
 0x133   : > { %v293_v24 = vpop.f32.mrf.mxu1 }
 0x134 PF: > { %p394_p4 = scmp.ge.s32.totalorder %s492_s21, 2  ;;  %s323_s6 = sand.u32 1, %s480_s18  }
 0x135   : > { %s324_s7 = scalar_lea.sflag [#allocation3], %s323_s6 }
 0x136   : > { %p391_p7 = pnand %p394_p4, %p567_p6 }
 0x138   : > { %p392_p8 = pneg %p391_p7 }
 0x13a   : > { %475 = dma.done.wait (%p392_p8), %s324_s7, 64  }
 0x13b   : > { %477 = vsyncadd (%p392_p8), %s324_s7, 4294967232  ;;  %p15_p9 = scmp.ge.s32.totalorder %s550_s24, 6   ;;  %s636_s18 = smov %s484_s19 }
 0x13c   : > { %s637_s19 = smov %s488_s20  ;;  %s638_s20 = smov %s561_s27 }
 0x13d   : > { %s639_s21 = smov %s550_s24  ;;  %17 = sbr.rel (!%p15_p9) target bundleno = 3 (0x3), region = 75 }
 0x142   :  { %330 = vsyncpa [#allocation3], 1 }
 0x143   :  { %332 = vsyncpa [#allocation3 + $0x1], 1 }

</bundles_post_ra>
